<compile_context>
chip_gen: v7x
topology: tpu7x:2x2x1
jax: 0.10.0
libtpu: 0.0.40
codegen_flags: <defaults>
</compile_context>

<pallas_src>
import jax
import jax.numpy as jnp
from jax.experimental import pallas as pl
from jax.experimental.pallas import tpu as pltpu


def _linear_block_kernel(x_ref, w_ref, b_ref, o_ref):
    """One (tm, tn) output tile; grid axis 2 loops over K chunks."""
    k = pl.program_id(2)

    @pl.when(k == 0)
    def _():
        o_ref[...] = jnp.zeros_like(o_ref)

    # bf16 (tm, tk) @ bf16 (tk, tn) -> f32 on the MXU, accumulated directly in
    # the f32 output block (VMEM-resident across the K loop).
    o_ref[...] += jnp.dot(x_ref[...], w_ref[...],
                          preferred_element_type=jnp.float32)

    @pl.when(k == pl.num_programs(2) - 1)
    def _():
        o_ref[...] = jnp.maximum(o_ref[...] + b_ref[...], 0.0)


def _round_up(x, m):
    return ((x + m - 1) // m) * m


def _pick_tile(dim, cap, align):
    """Tile for a non-contraction (M or N) dim.

    If the dim fits the cap, use the full dim (block == array extent is always
    a legal TPU block shape, no padding / edge masking).  Otherwise pick from a
    few aligned candidates the one minimizing edge-block waste (ties -> larger).
    """
    if dim <= cap:
        return dim
    best_c, best_waste = None, None
    for c in (cap, (3 * cap) // 4, cap // 2, cap // 4):
        c = max(align, (c // align) * align)
        waste = _round_up(dim, c) - dim
        if best_waste is None or waste < best_waste:
            best_c, best_waste = c, waste
    return best_c


def linear_block_forward(x, weight, bias, *, tm=512, tn=512, tk=512,
                         compute_dtype=jnp.bfloat16):
    """relu(x @ weight.T + bias) via a tiled Pallas TPU kernel.

    x:      (B, in_dim)        float32
    weight: (out_dim, in_dim)  PyTorch nn.Linear layout
    bias:   (out_dim,)
    """
    B, in_dim = x.shape
    out_dim, in_dim_w = weight.shape
    assert in_dim_w == in_dim, "weight shape mismatch"

    # ---- K (contraction) tiling: only K ever needs explicit zero-padding. ----
    if in_dim <= tk:
        tk = in_dim                       # single K block, no padding at all
        Kp = in_dim
    else:
        Kp = _round_up(in_dim, 128)       # lane alignment only
        m = tk // 128
        while (Kp // 128) % m != 0:       # largest 128-multiple dividing Kp
            m -= 1
        tk = 128 * m

    # ---- M / N tiles ----
    tm = _pick_tile(B, tm, 8)
    tn = _pick_tile(out_dim, tn, 128)

    # v7x has 2 TensorCores: make sure the two "parallel" axes give each core
    # at least one block (cheap no-op cost on single-core v5e/v6e).
    if pl.cdiv(B, tm) * pl.cdiv(out_dim, tn) < 2:
        if B >= 16:
            tm = _round_up(pl.cdiv(B, 2), 8)
        elif out_dim >= 256:
            tn = _round_up(pl.cdiv(out_dim, 2), 128)

    # ---- One-time wrapper prep: K-major weight, bf16 operands, K zero-pad. ----
    xb = x
    wt = weight.T                          # (in_dim, out_dim): canonical MXU RHS
    if Kp != in_dim:
        xb = jnp.pad(xb, ((0, 0), (0, Kp - in_dim)))
        wt = jnp.pad(wt, ((0, Kp - in_dim), (0, 0)))
    xb = xb.astype(compute_dtype)
    wt = wt.astype(compute_dtype)
    b2d = bias.reshape(1, out_dim).astype(jnp.float32)

    grid = (pl.cdiv(B, tm), pl.cdiv(out_dim, tn), Kp // tk)
    grid_m, grid_n, _ = grid

    cost = pl.CostEstimate(
        flops=2 * B * out_dim * Kp,
        transcendentals=0,
        # Account for re-streaming: x is read grid_n times, W grid_m times.
        bytes_accessed=(grid_n * B * Kp * xb.dtype.itemsize
                        + grid_m * Kp * out_dim * wt.dtype.itemsize
                        + grid_m * out_dim * 4
                        + B * out_dim * 4),
    )

    return pl.pallas_call(
        _linear_block_kernel,
        out_shape=jax.ShapeDtypeStruct((B, out_dim), jnp.float32),
        grid_spec=pltpu.PrefetchScalarGridSpec(
            num_scalar_prefetch=0,
            grid=grid,
            in_specs=[
                pl.BlockSpec((tm, tk), lambda i, j, k: (i, k)),   # x (M, K)
                pl.BlockSpec((tk, tn), lambda i, j, k: (k, j)),   # W^T (K, N)
                pl.BlockSpec((1, tn), lambda i, j, k: (0, j)),    # bias (1, N)
            ],
            out_specs=pl.BlockSpec((tm, tn), lambda i, j, k: (i, j)),
        ),
        compiler_params=pltpu.CompilerParams(
            dimension_semantics=("parallel", "parallel", "arbitrary")),
        cost_estimate=cost,
    )(xb, wt, b2d)


if __name__ == "__main__":
    # Small shapes consistent with the module: LinearBlock(in_dim=32, out_dim=64)
    B, in_dim, out_dim = 16, 32, 64

    key = jax.random.PRNGKey(0)
    kx, kw, kb = jax.random.split(key, 3)

    # Deterministic parameter init (PyTorch Linear-style uniform bound).
    bound = 1.0 / (in_dim ** 0.5)
    x = jax.random.normal(kx, (B, in_dim), dtype=jnp.float32)
    weight = jax.random.uniform(kw, (out_dim, in_dim), jnp.float32, -bound, bound)
    bias = jax.random.uniform(kb, (out_dim,), jnp.float32, -bound, bound)

    out = jax.block_until_ready(linear_block_forward(x, weight, bias))

    # Reference check against plain f32 JAX (bf16 inputs -> relaxed tolerance).
    ref = jnp.maximum(x @ weight.T + bias, 0.0)
    assert out.shape == (B, out_dim)
    assert out.dtype == jnp.float32
    assert jnp.allclose(out, ref, atol=2e-2, rtol=2e-2), "mismatch vs reference"

    print("KERNEL_OK")
</pallas_src>

<mosaic_0001>
module attributes {stable_mosaic.version = 11 : i64} {
  func.func @_linear_block_kernel(%arg0: i32, %arg1: i32, %arg2: i32, %arg3: memref<8x32xbf16, #tpu.memory_space<vmem>>, %arg4: memref<32x64xbf16, #tpu.memory_space<vmem>>, %arg5: memref<1x64xf32, #tpu.memory_space<vmem>>, %arg6: memref<8x64xf32, #tpu.memory_space<vmem>>) attributes {dimension_semantics = [#tpu.dimension_semantics<parallel>, #tpu.dimension_semantics<parallel>, #tpu.dimension_semantics<arbitrary>], iteration_bounds = array<i64: 2, 1, 1>, scalar_prefetch = 0 : i64, scratch_operands = 0 : i64, tpu.core_type = #tpu.core_type<tc>, window_params = [{transform_indices = @transform_0, window_bounds = array<i64: 8, 32>}, {transform_indices = @transform_1, window_bounds = array<i64: 32, 64>}, {transform_indices = @transform_2, window_bounds = array<i64: 1, 64>}, {transform_indices = @transform_3, window_bounds = array<i64: 8, 64>}]} {
    %c0_i32 = arith.constant 0 : i32
    %0 = arith.cmpi eq, %arg2, %c0_i32 : i32
    %1 = arith.extui %0 : i1 to i32
    %c0_i32_0 = arith.constant 0 : i32
    %2 = arith.cmpi ne, %1, %c0_i32_0 : i32
    scf.if %2 {
      %cst_10 = arith.constant 0.000000e+00 : f32
      %12 = vector.broadcast %cst_10 : f32 to vector<8x64xf32>
      %c0_11 = arith.constant 0 : index
      %c0_12 = arith.constant 0 : index
      %13 = vector.load %arg6[%c0_11, %c0_12] : memref<8x64xf32, #tpu.memory_space<vmem>>, vector<8x64xf32>
      tpu.vector_store %arg6[%c0_11, %c0_12], %12 {strides = array<i32>} : memref<8x64xf32, #tpu.memory_space<vmem>>, vector<8x64xf32>,
    } else {
    }
    %c0 = arith.constant 0 : index
    %c0_1 = arith.constant 0 : index
    %3 = vector.load %arg6[%c0, %c0_1] : memref<8x64xf32, #tpu.memory_space<vmem>>, vector<8x64xf32>
    %c0_2 = arith.constant 0 : index
    %c0_3 = arith.constant 0 : index
    %4 = vector.load %arg3[%c0_2, %c0_3] : memref<8x32xbf16, #tpu.memory_space<vmem>>, vector<8x32xbf16>
    %c0_4 = arith.constant 0 : index
    %c0_5 = arith.constant 0 : index
    %5 = vector.load %arg4[%c0_4, %c0_5] : memref<32x64xbf16, #tpu.memory_space<vmem>>, vector<32x64xbf16>
    %cst = arith.constant dense<0.000000e+00> : vector<8x64xf32>
    %6 = tpu.matmul %4, %5, %cst {dimension_numbers = #tpu.dot_dimension_numbers<[1], [0], [0], [1], [0, 0, 1, 1], [], []>} : vector<8x32xbf16>, vector<32x64xbf16>, vector<8x64xf32> -> vector<8x64xf32>
    %7 = arith.addf %3, %6 : vector<8x64xf32>
    %c0_6 = arith.constant 0 : index
    %c0_7 = arith.constant 0 : index
    %8 = vector.load %arg6[%c0_6, %c0_7] : memref<8x64xf32, #tpu.memory_space<vmem>>, vector<8x64xf32>
    tpu.vector_store %arg6[%c0_6, %c0_7], %7 {strides = array<i32>} : memref<8x64xf32, #tpu.memory_space<vmem>>, vector<8x64xf32>,
    %c0_i32_8 = arith.constant 0 : i32
    %9 = arith.cmpi eq, %arg2, %c0_i32_8 : i32
    %10 = arith.extui %9 : i1 to i32
    %c0_i32_9 = arith.constant 0 : i32
    %11 = arith.cmpi ne, %10, %c0_i32_9 : i32
    scf.if %11 {
      %c0_10 = arith.constant 0 : index
      %c0_11 = arith.constant 0 : index
      %12 = vector.load %arg6[%c0_10, %c0_11] : memref<8x64xf32, #tpu.memory_space<vmem>>, vector<8x64xf32>
      %c0_12 = arith.constant 0 : index
      %c0_13 = arith.constant 0 : index
      %13 = vector.load %arg5[%c0_12, %c0_13] : memref<1x64xf32, #tpu.memory_space<vmem>>, vector<1x64xf32>
      %14 = vector.broadcast %13 : vector<1x64xf32> to vector<8x64xf32>
      %15 = arith.addf %12, %14 : vector<8x64xf32>
      %cst_14 = arith.constant 0.000000e+00 : f32
      %16 = vector.broadcast %cst_14 : f32 to vector<8x64xf32>
      %17 = arith.maximumf %15, %16 : vector<8x64xf32>
      %c0_15 = arith.constant 0 : index
      %c0_16 = arith.constant 0 : index
      %18 = vector.load %arg6[%c0_15, %c0_16] : memref<8x64xf32, #tpu.memory_space<vmem>>, vector<8x64xf32>
      tpu.vector_store %arg6[%c0_15, %c0_16], %17 {strides = array<i32>} : memref<8x64xf32, #tpu.memory_space<vmem>>, vector<8x64xf32>,
    } else {
    }
    return
  }
  func.func @transform_0(%arg0: i32, %arg1: i32, %arg2: i32) -> (i32, i32) {
    %c0_i32 = arith.constant 0 : i32
    return %arg0, %arg2 : i32, i32
  }
  func.func @transform_1(%arg0: i32, %arg1: i32, %arg2: i32) -> (i32, i32) {
    %c0_i32 = arith.constant 0 : i32
    return %arg2, %arg1 : i32, i32
  }
  func.func @transform_2(%arg0: i32, %arg1: i32, %arg2: i32) -> (i32, i32) {
    %c0_i32 = arith.constant 0 : i32
    %c0_i32_0 = arith.constant 0 : i32
    return %c0_i32, %arg1 : i32, i32
  }
  func.func @transform_3(%arg0: i32, %arg1: i32, %arg2: i32) -> (i32, i32) {
    %c0_i32 = arith.constant 0 : i32
    return %arg0, %arg1 : i32, i32
  }
}

</mosaic_0001>

<bundles_post_ra>
// kernel: tpu_custom_call.1
= control target key start
LH: loop header
LB: loop body
LE: loop exit
PB: predicated region body
PF: predicated region fallthrough
CT: control target
= control target key end

     0   :  { %8 = vsyncpa [#allocation3], 0  ;;  %s965_s0 = inlined_call_operand.hbm [shape: bf16[16,32], index: 0, kind: input, shape index: {}]   ;;  %s966_s1 = inlined_call_operand.hbm [shape: bf16[32,64], index: 1, kind: input, shape index: {}]   ;;  %s967_s2 = inlined_call_operand.vmem [shape: f32[1,64], index: 2, kind: input, shape index: {}]   ;;  %s968_s3 = inlined_call_operand.hbm [shape: f32[16,64], index: 3, kind: output, shape index: {}]  }
   0x1   :  { %10 = vsyncpa [#allocation3 + $0x1], 0 }
   0x2   :  { %11 = vsyncpa [#allocation6], 0 }
   0x3   :  { %12 = vsyncpa [#allocation4], 0 }
   0x4   :  { %14 = vsyncpa [#allocation4 + $0x1], 0  ;;  %s744_s12 = smov 0   ;;  %s746_s13 = smov 0  }
   0x5   :  { %s748_s14 = smov 0   ;;  %s750_s15 = smov 0  }
   0x6   :  { %s752_s16 = smov 0   ;;  %s754_s17 = smov 0  }
   0x7 LB: > { %s461_s18 = sadd.s32 4294967295, %s715_s17   ;;  %s462_s19 = sadd.s32 4294967294, %s715_s17   ;;  %s715_s17 = sphi %s754_s17, %s20_s17   ;;  %s711_s16 = sphi %s752_s16, %s992_s16   ;;  %s707_s15 = sphi %s750_s15, %s991_s15   ;;  %s703_s14 = sphi %s748_s14, %s990_s14   ;;  %s699_s13 = sphi %s746_s13, %s989_s13   ;;  %s695_s12 = sphi %s744_s12, %s988_s12  }
   0x8   : > { %p61_p0 = scmp.ne.s32.totalorder %s699_s13, %s695_s12  ;;  %p778_p1 = scmp.eq.s32.totalorder %s461_s18, 0 }
   0x9   : > { %p782_p2 = scmp.eq.s32.totalorder %s461_s18, 1  ;;  %p147_p3 = scmp.eq.s32.totalorder %s462_s19, 1 }
   0xa   : > { %s973_s20 = scalar_select %p778_p1, 1, 0 }
   0xb   : > { %s974_s21 = scalar_select %p782_p2, 1, 0 }
   0xc   : > { %p788_p4 = por %p778_p1, %p61_p0  ;;  %p463_p5 = scmp.ge.s32.totalorder %s715_s17, 1 }
   0xd   : > { %p793_p6 = por %p147_p3, %p61_p0  ;;  %p154_p7 = scmp.lt.s32.totalorder %s715_s17, 3 }
   0xe   : > { %s975_s22 = scalar_select %p788_p4, 1, 0 }
   0xf   : > { %s976_s23 = scalar_select %p793_p6, 1, 0 }
  0x10   : > { %p798_p8 = pnand %p463_p5, %p154_p7  ;;  %s717_s25 = smov [#allocation5]  }
  0x11   : > { %s170_s26 = sshll.u32 %s717_s25, 4  ;;  %s39_s28 = sadd.s32 1, %s711_s16  ;;  %s171_s26 = int_to_ptr.vmem [resolvable:$true] %s170_s26 }
  0x12   : > { %s977_s24 = scalar_select %p798_p8, 1, 0 }
  0x13   : > { %p500_p9 = pneg %p798_p8  ;;  %s571_s4 = scalar_lea.hbm %s966_s1, 256 }
  0x14   : > { %p572_p12 = scmp.ne.s32.totalorder %s966_s1, %s571_s4  ;;  %p578_p5 = scmp.lt.u32.totalorder %s571_s4, %s966_s1 }
  0x15   : > { %p807_p11 = pnand %p500_p9, %p778_p1 }
  0x17   : > { %p573_p13 = pneg %p807_p11 }
  0x19   : > { %p574_p0 = pnand %p573_p13, %p572_p12 }
  0x1b   : > { %p575_p3 = pneg %p574_p0 }
  0x1d   : > { %p580_p7 = pnand %p578_p5, %p575_p3 }
  0x1f   : > { %583 = shalt.err (!%p580_p7)
}
  0x20   : > { %s584_s9 = scalar_lea.vmem %s171_s26, 256  ;;  %p592_p1 = scmp.lt.s32.totalorder %s171_s26, %s171_s26 }
  0x21   : > { %p585_p9 = scmp.ne.s32.totalorder %s171_s26, %s584_s9  ;;  %p593_p4 = scmp.lt.s32.totalorder %s584_s9, %s584_s9 }
  0x23   : > { %p587_p10 = pnand %p585_p9, %p573_p13  ;;  %p594_p8 = por %p593_p4, %p592_p1 }
  0x25   : > { %p588_p6 = pneg %p587_p10 }
  0x27   : > { %p595_p2 = pnand %p594_p8, %p588_p6 }
  0x29   : > { %598 = shalt.err (!%p595_p2)
}
  0x2a   : > { %s718_s10 = smov 64   ;;  %s719_s11 = smov 4  }
  0x2b   : > { %503 = dma.hbm_to_vmem [thread:$0]  (!%p807_p11), %s966_s1, 256, %s171_s26, [#allocation6], %s718_s10, %s718_s10, %s719_s11  }
  0x2c   : > { %p41_p1 = scmp.ge.s32.totalorder %s39_s28, 2  ;;  %s48_s25 = sadd.s32 1, %s703_s14 }
  0x2d   : > { %p55_p2 = scmp.ne.s32.totalorder %s703_s14, %s699_s13  ;;  %p56_p4 = scmp.eq.s32.totalorder %s715_s17, 0 }
  0x2e   : > { %s994_s28 = smov (%p41_p1, %s39_s28), 0  ;;  %p980_p8 = scmp.ne.s32.totalorder %s974_s21, 0 }
  0x2f   : > { %p834_p6 = por %p56_p4, %p55_p2  ;;  %s43_s27 = ssub.s32 %s711_s16, %s994_s28 }
  0x30   : > { %p840_p10 = por %p980_p8, %p55_p2  ;;  %p513_p12 = scmp.lt.s32.totalorder %s715_s17, 2 }
  0x31   : > { %p46_p11 = scmp.eq.s32.totalorder %s43_s27, 0  ;;  %s190_s26 = sand.u32 1, %s703_s14  }
  0x32   : > { %s467_s4 = sshll.u32 %s190_s26, 2  ;;  %s468_s6 = sshll.u32 %s711_s16, 6 }
  0x33   : > { %s849_s5 = scalar_select %p46_p11, %s703_s14, %s48_s25  }
  0x34   : > { %s855_s9 = scalar_lea.hbm %s965_s0, %s468_s6  ;;  %s194_s21 = scalar_lea.vmem [#allocation2], %s467_s4 }
  0x35   : > { %s202_s10 = sshll.u32 %s194_s21, 4  ;;  %p861_p13 = pnand %p513_p12, %p834_p6  ;;  %s857_s10 = int_to_ptr.vmem [resolvable:$true] %s202_s10 }
  0x36   : > { %s191_s18 = scalar_lea.sflag [#allocation3], %s190_s26  ;;  %s599_s19 = scalar_lea.hbm %s855_s9, 64 }
  0x37   : > { %p600_p0 = scmp.ne.s32.totalorder %s855_s9, %s599_s19  ;;  %p601_p3 = pneg %p861_p13 }
  0x38   : > { %s604_s4 = scalar_lea.hbm %s965_s0, 128  ;;  %p605_p9 = scmp.lt.u32.totalorder %s855_s9, %s965_s0 }
  0x39   : > { %p602_p5 = pnand %p601_p3, %p600_p0  ;;  %p606_p1 = scmp.lt.u32.totalorder %s604_s4, %s599_s19 }
  0x3a   : > { %p608_p4 = scmp.lt.u32.totalorder %s599_s19, %s855_s9 }
  0x3b   : > { %p603_p7 = pneg %p602_p5  ;;  %p607_p2 = por %p606_p1, %p605_p9 }
  0x3d   : > { %p609_p6 = por %p608_p4, %p607_p2 }
  0x3f   : > { %p610_p8 = pnand %p609_p6, %p603_p7 }
  0x41   : > { %613 = shalt.err (!%p610_p8)
}
  0x42   : > { %s614_s26 = scalar_lea.vmem %s857_s10, 64  ;;  %s720_s7 = smov [#allocation2]  }
  0x43   : > { %p615_p12 = scmp.ne.s32.totalorder %s857_s10, %s614_s26  ;;  %s619_s8 = sshll.u32 %s720_s7, 4  ;;  %s620_s8 = int_to_ptr.vmem [resolvable:$false] %s619_s8 }
  0x44   : > { %s621_s21 = scalar_lea.vmem %s620_s8, 128  ;;  %p622_p5 = scmp.lt.s32.totalorder %s857_s10, %s620_s8 }
  0x45   : > { %p617_p11 = pnand %p615_p12, %p601_p3  ;;  %p623_p9 = scmp.lt.s32.totalorder %s621_s21, %s614_s26 }
  0x47   : > { %p618_p0 = pneg %p617_p11  ;;  %p624_p1 = por %p623_p9, %p622_p5 }
  0x49   : > { %p625_p2 = pnand %p624_p1, %p618_p0 }
  0x4b   : > { %628 = shalt.err (!%p625_p2)
}
  0x4c   : > { %507 = dma.hbm_to_vmem [thread:$0]  (!%p861_p13), %s855_s9, 64, %s857_s10, %s191_s18  }
  0x4d   : > { %p983_p7 = scmp.ne.s32.totalorder %s977_s24, 0 }
  0x4e   : > { %s893_s19 = sand.u32 (!%p983_p7), 1, %s699_s13   ;;  %p984_p3 = scmp.ne.s32.totalorder (!%p983_p7), %s975_s22, 0 }
  0x4f   : > { %211 = sbr.rel (%p983_p7) target bundleno = 339 (0x153), region = 32  ;;  %s470_s25 = sshll.u32 (!%p983_p7), %s893_s19, 2 }
  0x50   : > { %s214_s27 = scalar_lea.sflag (!%p983_p7), [#allocation3], %s893_s19  ;;  %s217_s4 = scalar_lea.vmem (!%p983_p7), [#allocation2], %s470_s25 }
  0x56   : > { %682 = dma.done.wait (%p984_p3), %s214_s27, 64  }
  0x57   : > { %684 = vsyncadd (%p984_p3), %s214_s27, 4294967232  ;;  %p985_p4 = scmp.ne.s32.totalorder %s973_s20, 0 }
  0x59   : > { %686 = dma.done.wait (%p985_p4), [#allocation6], 256  }
  0x5a   : > { %688 = vsyncadd (%p985_p4), [#allocation6], 4294967040  ;;  %s472_s24 = sshll.u32 %s893_s19, 3  ;;  %vm256_vm0 = vcmask 523264   ;;  %v721_v0 = vmov 0.0   ;;  %vm722_vm1 = vmmov 0  }
  0x5b   : > { %484 = vmatprep.subr.bf16.mxu0 %v721_v0  ;;  %488 = vmatprep.mubr.msk.bf16.mxu0 %vm722_vm1, %v721_v0  ;;  %s246_s9 = scalar_lea.vmem [#allocation7], %s472_s24  ;;  %v569_v1 = vld [vmem:[#allocation5] sm:$0xff]   ;;  %v570_v2 = vld [vmem:[#allocation5 + $0x8] sm:$0xff]   ;;  %v259_v3 = vld [vmem:[%s217_s4] sm:$0xf]  ;;  %vm276_vm2 = vcmask 261120  }
  0x5c   : > { %257 = vst.msk [vmem:[%s246_s9] sm:$0xff] %vm256_vm0, %v721_v0  ;;  %485 = vmatpush3.bf16.msra.mxu0 %v569_v1  ;;  %v476_v10 = vld [vmem:[%s967_s2] ss:$0 sm:$0xff]  ;;  %s478_s10 = sshll.u32 %s707_s15, 7  ;;  %s352_s11 = sshll.u32 %s246_s9, 4  ;;  %s917_s11 = int_to_ptr.vmem [resolvable:$true] %s352_s11 }
  0x5d   : > { %486 = vmatprep.subr.bf16.mxu0 %v721_v0  ;;  %s915_s6 = scalar_lea.hbm %s968_s3, %s478_s10  ;;  %s338_s26 = scalar_lea.sflag [#allocation4], %s893_s19 }
  0x5e   : > { %s629_s7 = scalar_lea.vmem %s917_s11, 128  ;;  %s723_s15 = smov [#allocation7]  }
  0x5f   : > { %p630_p13 = scmp.ne.s32.totalorder %s917_s11, %s629_s7  ;;  %s633_s8 = sshll.u32 %s723_s15, 4  ;;  %s634_s8 = int_to_ptr.vmem [resolvable:$false] %s633_s8 }
  0x60   : > { %487 = vmatpush3.bf16.msra.mxu0 %v570_v2  ;;  %s635_s21 = scalar_lea.vmem %s634_s8, 256  ;;  %p636_p12 = scmp.lt.s32.totalorder %s917_s11, %s634_s8 }
  0x61   : > { %p631_p6 = pnand %p630_p13, %p840_p10  ;;  %p637_p11 = scmp.lt.s32.totalorder %s635_s21, %s629_s7 }
  0x63   : > { %489 = vmatmul.mubr.msk.bf16.vlgmr.msra.gmra.mrb[0].mxu0 %vm276_vm2, %v259_v3  ;;  %v258_v4 = vld [vmem:[%s246_s9] sm:$0xff]  ;;  %p632_p8 = pneg %p631_p6  ;;  %p638_p0 = por %p637_p11, %p636_p12 }
  0x65   : > { %p639_p5 = pnand %p638_p0, %p632_p8 }
 0x136   : > { %v314_v5 = vpop.f32.mrb[0].mxu0 }
 0x137   : > { %v320_v6 = vadd.f32 %v314_v5, %v258_v4  ;;  %v490_v7 = vpop.f32.mrb[1].mxu0 }
 0x138   : > { %v317_v8 = vpop.f32.mrb[2].mxu0 }
 0x139   : > { %322 = vst.msk [vmem:[%s246_s9] sm:$0xff] %vm256_vm0, %v320_v6  ;;  %v491_v9 = vpop.f32.mrb[3].mxu0 }
 0x140   : > { %v326_v11 = vld [vmem:[%s246_s9] sm:$0xff] }
 0x141   : > { %v334_v12 = vadd.f32 %v476_v10, %v326_v11 }
 0x143   : > { %v335_v13 = vmax.f32 %v334_v12, 0.0 }
 0x145   : > { %336 = vst.msk [vmem:[%s246_s9] sm:$0xff] %vm256_vm0, %v335_v13 }
 0x146   : > { %642 = shalt.err (!%p639_p5)
}
 0x147   : > { %s643_s19 = scalar_lea.hbm %s915_s6, 128  ;;  %s647_s4 = scalar_lea.hbm %s968_s3, 256 }
 0x148   : > { %p644_p9 = scmp.ne.s32.totalorder %s915_s6, %s643_s19  ;;  %p648_p7 = scmp.lt.u32.totalorder %s915_s6, %s968_s3 }
 0x149   : > { %p649_p3 = scmp.lt.u32.totalorder %s647_s4, %s643_s19  ;;  %p651_p13 = scmp.lt.u32.totalorder %s643_s19, %s915_s6 }
 0x14a   : > { %p645_p1 = pnand %p644_p9, %p840_p10 }
 0x14b   : > { %p650_p4 = por %p649_p3, %p648_p7 }
 0x14c   : > { %p646_p2 = pneg %p645_p1 }
 0x14d   : > { %p652_p6 = por %p651_p13, %p650_p4 }
 0x14f   : > { %p653_p8 = pnand %p652_p6, %p646_p2 }
 0x151   : > { %656 = shalt.err (!%p653_p8)
}
 0x152   : > { %498 = dma.vmem_to_hbm [thread:$0]  (%p840_p10), %s917_s11, 128, %s915_s6, %s338_s26  }
 0x153 PF: > { %s364_s20 = sand.u32 1, %s695_s12   ;;  %p986_p12 = scmp.ne.s32.totalorder %s976_s23, 0 }
 0x154   : > { %p987_p11 = scmp.ge.s32.totalorder %s715_s17, 2  ;;  %s365_s22 = scalar_lea.sflag [#allocation4], %s364_s20 }
 0x156   : > { %p509_p0 = pnand %p987_p11, %p986_p12 }
 0x158   : > { %690 = dma.done.wait (!%p509_p0), %s365_s22, 128  }
 0x159   : > { %692 = vsyncadd (!%p509_p0), %s365_s22, 4294967168  ;;  %s20_s17 = sadd.s32 1, %s715_s17   ;;  %s988_s12 = smov %s699_s13 }
 0x15a   : > { %p17_p5 = scmp.ge.s32.totalorder %s20_s17, 4   ;;  %s989_s13 = smov %s703_s14 }
 0x15b   : > { %s990_s14 = smov %s849_s5  ;;  %s991_s15 = smov %s711_s16 }
 0x15c   : > { %s992_s16 = smov %s994_s28  ;;  %19 = sbr.rel (!%p17_p5) target bundleno = 7 (0x7), region = 93 }
 0x163   :  { %370 = vsyncpa [#allocation3], 1 }
 0x164   :  { %372 = vsyncpa [#allocation3 + $0x1], 1 }
 0x165   :  { %373 = vsyncpa [#allocation6], 1 }
 0x166   :  { %374 = vsyncpa [#allocation4], 1 }
 0x167   :  { %376 = vsyncpa [#allocation4 + $0x1], 1 }

</bundles_post_ra>
